<compile_context>
chip_gen: v7x
topology: tpu7x:2x2x1
jax: 0.10.0
libtpu: 0.0.40
codegen_flags: <defaults>
</compile_context>

<pallas_src>
import jax
import jax.numpy as jnp
from jax.experimental import pallas as pl
from jax.experimental.pallas import tpu as pltpu


def _vndecoder_kernel(w_ref, x_ref, o_ref):
    # w_ref: (C_out, C_in)  folded weight (grid-invariant, stays resident)
    # x_ref: (C_in, TN)     one lane-dense tile of one batch (batch dim squeezed)
    # o_ref: (C_out, TN)
    o_ref[...] = jnp.dot(
        w_ref[...], x_ref[...], preferred_element_type=jnp.float32
    ).astype(o_ref.dtype)


def vndecoder_forward(x, w1, w2, w3, *, lane_tile=2048):
    """x: [B, C_in, 3, N] float32.  wi: PyTorch-style Linear weights [out, in]."""
    B, C_in, three, N = x.shape
    assert three == 3
    C_out = w3.shape[0]

    # Fold the linear chain into a single channel-mixing matrix (valid: no ReLU).
    wc = (w3 @ (w2 @ w1)).astype(jnp.float32)          # (C_out, C_in)

    M = 3 * N
    x2 = x.reshape(B, C_in, M)                          # contiguous reshape, no copy

    if M <= lane_tile:
        tn, Mp = M, M                                   # full-extent lane block
    else:
        tn = lane_tile                                  # multiple of 128
        Mp = pl.cdiv(M, tn) * tn
        if Mp != M:
            x2 = jnp.pad(x2, ((0, 0), (0, 0), (0, Mp - M)))

    grid = (B, Mp // tn)

    out = pl.pallas_call(
        _vndecoder_kernel,
        out_shape=jax.ShapeDtypeStruct((B, C_out, Mp), x.dtype),
        grid_spec=pltpu.PrefetchScalarGridSpec(
            num_scalar_prefetch=0,
            grid=grid,
            in_specs=[
                # Folded weight: same block for every grid step (grid-invariant).
                pl.BlockSpec((C_out, C_in), lambda b, j: (0, 0)),
                # One lane-dense tile of one batch; batch dim squeezed out.
                pl.BlockSpec((None, C_in, tn), lambda b, j: (b, 0, j)),
            ],
            out_specs=pl.BlockSpec((None, C_out, tn), lambda b, j: (b, 0, j)),
        ),
        compiler_params=pltpu.CompilerParams(
            dimension_semantics=("parallel", "parallel")),
        cost_estimate=pl.CostEstimate(
            flops=2 * B * Mp * C_in * C_out,
            transcendentals=0,
            bytes_accessed=(B * Mp * (C_in + C_out) + C_in * C_out) * 4),
    )(wc, x2)

    return out[:, :, :M].reshape(B, C_out, 3, N)


def _init_linear_weight(key, out_f, in_f):
    # Deterministic synthetic init (PyTorch-Linear-like uniform range).
    bound = 1.0 / jnp.sqrt(in_f)
    return jax.random.uniform(key, (out_f, in_f), jnp.float32, -bound, bound)


def _ref(x, w1, w2, w3):
    # Pure-JAX reference of the PyTorch forward (three separate VNLinear layers).
    h = jnp.einsum("bcvn,oc->bovn", x, w1)
    h = jnp.einsum("bcvn,oc->bovn", h, w2)
    return jnp.einsum("bcvn,oc->bovn", h, w3)


if __name__ == "__main__":
    key = jax.random.PRNGKey(0)
    kx, k1, k2, k3, kx2 = jax.random.split(key, 5)

    B, C_in, C_out, N = 2, 4, 8, 16          # x: [2, 4, 3, 16]
    x = jax.random.normal(kx, (B, C_in, 3, N), jnp.float32)
    w1 = _init_linear_weight(k1, 128, C_in)
    w2 = _init_linear_weight(k2, 256, 128)
    w3 = _init_linear_weight(k3, C_out, 256)

    y = jax.block_until_ready(vndecoder_forward(x, w1, w2, w3))
    y_ref = _ref(x, w1, w2, w3)
    assert y.shape == (B, C_out, 3, N), y.shape
    assert jnp.allclose(y, y_ref, atol=1e-4, rtol=1e-4), float(
        jnp.max(jnp.abs(y - y_ref)))

    # Second shape exercising the tiled + zero-padded lane path (3*N > lane_tile).
    N2 = 300                                  # M = 900 -> padded to 1024, tile 512
    x_big = jax.random.normal(kx2, (B, C_in, 3, N2), jnp.float32)
    y_big = jax.block_until_ready(
        vndecoder_forward(x_big, w1, w2, w3, lane_tile=512))
    y_big_ref = _ref(x_big, w1, w2, w3)
    assert y_big.shape == (B, C_out, 3, N2), y_big.shape
    assert jnp.allclose(y_big, y_big_ref, atol=1e-4, rtol=1e-4), float(
        jnp.max(jnp.abs(y_big - y_big_ref)))

    print("KERNEL_OK")
</pallas_src>

<mosaic_0001>
module attributes {stable_mosaic.version = 11 : i64} {
  func.func @_vndecoder_kernel(%arg0: i32, %arg1: i32, %arg2: memref<8x4xf32, #tpu.memory_space<vmem>>, %arg3: memref<1x4x48xf32, #tpu.memory_space<vmem>>, %arg4: memref<1x8x48xf32, #tpu.memory_space<vmem>>) attributes {dimension_semantics = [#tpu.dimension_semantics<parallel>, #tpu.dimension_semantics<parallel>], iteration_bounds = array<i64: 2, 1>, scalar_prefetch = 0 : i64, scratch_operands = 0 : i64, tpu.core_type = #tpu.core_type<tc>, window_params = [{pipeline_mode = #tpu.pipeline_mode<synchronous>, transform_indices = @transform_0, window_bounds = array<i64: 8, 4>}, {transform_indices = @transform_1, window_bounds = array<i64: 1, 4, 48>}, {transform_indices = @transform_2, window_bounds = array<i64: 1, 8, 48>}]} {
    %c0 = arith.constant 0 : index
    %c0_0 = arith.constant 0 : index
    %0 = vector.load %arg2[%c0, %c0_0] : memref<8x4xf32, #tpu.memory_space<vmem>>, vector<8x4xf32>
    %c0_1 = arith.constant 0 : index
    %c0_2 = arith.constant 0 : index
    %c0_3 = arith.constant 0 : index
    %1 = vector.load %arg3[%c0_1, %c0_2, %c0_3] : memref<1x4x48xf32, #tpu.memory_space<vmem>>, vector<1x4x48xf32>
    %2 = vector.shape_cast %1 : vector<1x4x48xf32> to vector<4x48xf32>
    %cst = arith.constant dense<0.000000e+00> : vector<8x48xf32>
    %3 = tpu.matmul %0, %2, %cst {dimension_numbers = #tpu.dot_dimension_numbers<[1], [0], [0], [1], [0, 0, 1, 1], [], []>} : vector<8x4xf32>, vector<4x48xf32>, vector<8x48xf32> -> vector<8x48xf32>
    %c0_4 = arith.constant 0 : index
    %c0_5 = arith.constant 0 : index
    %c0_6 = arith.constant 0 : index
    %4 = vector.load %arg4[%c0_4, %c0_5, %c0_6] : memref<1x8x48xf32, #tpu.memory_space<vmem>>, vector<1x8x48xf32>
    %5 = vector.shape_cast %4 : vector<1x8x48xf32> to vector<8x48xf32>
    %6 = vector.shape_cast %3 : vector<8x48xf32> to vector<1x8x48xf32>
    tpu.vector_store %arg4[%c0_4, %c0_5, %c0_6], %6 {strides = array<i32>} : memref<1x8x48xf32, #tpu.memory_space<vmem>>, vector<1x8x48xf32>,
    return
  }
  func.func @transform_0(%arg0: i32, %arg1: i32) -> (i32, i32) {
    %c0_i32 = arith.constant 0 : i32
    %c0_i32_0 = arith.constant 0 : i32
    %c0_i32_1 = arith.constant 0 : i32
    return %c0_i32, %c0_i32_0 : i32, i32
  }
  func.func @transform_1(%arg0: i32, %arg1: i32) -> (i32, i32, i32) {
    %c0_i32 = arith.constant 0 : i32
    %c0_i32_0 = arith.constant 0 : i32
    return %arg0, %c0_i32, %arg1 : i32, i32, i32
  }
  func.func @transform_2(%arg0: i32, %arg1: i32) -> (i32, i32, i32) {
    %c0_i32 = arith.constant 0 : i32
    %c0_i32_0 = arith.constant 0 : i32
    return %arg0, %c0_i32, %arg1 : i32, i32, i32
  }
}

</mosaic_0001>

<bundles_post_ra>
// kernel: tpu_custom_call.1
= control target key start
LH: loop header
LB: loop body
LE: loop exit
PB: predicated region body
PF: predicated region fallthrough
CT: control target
= control target key end

     0   :  { %7 = vsyncpa [#allocation3], 0  ;;  %s622_s0 = inlined_call_operand.vmem [shape: f32[8,4], index: 0, kind: input, shape index: {}]   ;;  %s623_s1 = inlined_call_operand.vmem [shape: f32[2,4,48], index: 1, kind: input, shape index: {}]   ;;  %s624_s2 = inlined_call_operand.hbm [shape: f32[2,8,48], index: 2, kind: output, shape index: {}]  }
   0x1   :  { %9 = vsyncpa [#allocation3 + $0x1], 0  ;;  %s507_s9 = smov 0   ;;  %s509_s10 = smov 0  }
   0x2   :  { %s511_s11 = smov 0   ;;  %s513_s12 = smov 0  }
   0x3   :  { %s515_s13 = smov 0   ;;  %s517_s14 = smov 0  }
   0x4 LB: > { %s332_s15 = sadd.s32 4294967295, %s487_s14   ;;  %s333_s16 = sadd.s32 4294967294, %s487_s14   ;;  %s487_s14 = sphi %s517_s14, %s15_s14   ;;  %s483_s13 = sphi %s515_s13, %s631_s13   ;;  %s479_s12 = sphi %s513_s12, %s630_s12   ;;  %s475_s11 = sphi %s511_s11, %s629_s11   ;;  %s471_s10 = sphi %s509_s10, %s628_s10   ;;  %s467_s9 = sphi %s507_s9, %s627_s9  }
   0x5   : > { %s27_s17 = sadd.s32 1, %s483_s13  ;;  %s85_s18 = sadd.s32 1, %s475_s11 }
   0x6   : > { %p29_p0 = scmp.ge.s32.totalorder %s27_s17, 2  ;;  %p95_p1 = scmp.ne.s32.totalorder %s475_s11, %s471_s10 }
   0x7   : > { %p96_p2 = scmp.eq.s32.totalorder %s332_s15, 1  ;;  %p101_p3 = scmp.ne.s32.totalorder %s471_s10, %s467_s9 }
   0x8   : > { %s633_s17 = smov (%p29_p0, %s27_s17), 0  ;;  %p102_p5 = scmp.eq.s32.totalorder %s333_s16, 1 }
   0x9   : > { %p547_p4 = por %p96_p2, %p95_p1  ;;  %s80_s20 = ssub.s32 %s483_s13, %s633_s17 }
   0xa   : > { %p336_p6 = scmp.ge.s32.totalorder %s487_s14, 1  ;;  %p83_p7 = scmp.eq.s32.totalorder %s80_s20, 0 }
   0xb   : > { %p554_p8 = por %p102_p5, %p101_p3  ;;  %p133_p9 = scmp.lt.s32.totalorder %s487_s14, 3 }
   0xc   : > { %s560_s22 = scalar_select %p83_p7, %s475_s11, %s85_s18  }
   0xd   : > { %p134_p10 = pnand %p336_p6, %p133_p9 }
   0xe   : > { %p157_p11 = scmp.lt.s32.totalorder (!%p134_p10), %s479_s12, 1  ;;  %v489_v0 = vmov (!%p134_p10), 0.0   ;;  %vm490_vm0 = vmmov (!%p134_p10), 0   ;;  %vm170_vm1 = vcmask (!%p134_p10), 1043456   ;;  %v164_v1 = vld [vmem:[%s622_s0] sm:$0xff] (!%p134_p10)  ;;  %vm166_vm2 = vcmask (!%p134_p10), 31744  }
   0xf   : > { %137 = sbr.rel (%p134_p10) target bundleno = 254 (0xfe), region = 28  ;;  %347 = vmatprep.subr.mxu0 (!%p134_p10), %v489_v0  ;;  %349 = vmatprep.mubr.msk.f32.mxu0 (!%p134_p10), %vm490_vm0, %v489_v0  ;;  %s154_s30 = sand.u32 (!%p134_p10), 1, %s471_s10   ;;  %vm244_vm3 = vcmask (!%p134_p10), 392192  }
  0x10   : > { %s337_s3 = sshll.u32 (!%p134_p10), %s154_s30, 3  ;;  %s342_s4 = sshll.u32 (!%p134_p10), %s479_s12, 7 }
  0x11   : > { %s156_s5 = scalar_lea.vmem (!%p134_p10), [#allocation2], %s337_s3  ;;  %s575_s15 = scalar_lea.hbm (!%p134_p10), %s624_s2, %s342_s4 }
  0x12   : > { %s261_s6 = sshll.u32 (!%p134_p10), %s156_s5, 4  ;;  %s247_s16 = scalar_lea.sflag (!%p134_p10), [#allocation3], %s154_s30  ;;  %s577_s6 = int_to_ptr.vmem [resolvable:$true] %s261_s6 }
  0x13   : > { %s409_s18 = scalar_lea.vmem (!%p134_p10), %s577_s6, 128 }
  0x14   : > { %p410_p12 = scmp.ne.s32.totalorder (!%p134_p10), %s577_s6, %s409_s18 }
  0x16   : > { %s158_s23 = scalar_select %p157_p11, %s479_s12, 1 }
  0x17   : > { %p411_p13 = pnand %p410_p12, %p547_p4  ;;  %s491_s12 = smov [#allocation2]  }
  0x18   : > { %s338_s24 = sshll.u32 %s158_s23, 2  ;;  %s413_s20 = sshll.u32 %s491_s12, 4  ;;  %s414_s20 = int_to_ptr.vmem [resolvable:$false] %s413_s20 }
  0x19   : > { %s163_s27 = scalar_lea.vmem %s623_s1, %s338_s24  ;;  %p412_p0 = pneg %p411_p13 }
  0x1a   : > { %v165_v2 = vld [vmem:[%s163_s27] sm:$0xf]  ;;  %s415_s23 = scalar_lea.vmem %s414_s20, 256  ;;  %p416_p1 = scmp.lt.s32.totalorder %s577_s6, %s414_s20 }
  0x1b   : > { %348 = vmatpush3.msk.msra.mxu0 %vm170_vm1, %v165_v2  ;;  %p417_p2 = scmp.lt.s32.totalorder %s415_s23, %s409_s18 }
  0x1c   : > { %350 = vmatmul.mubr.msk.f32.vlgmr.msra.gmra.mrb[0].mxu0 %vm166_vm2, %v164_v1 }
  0x1d   : > { %p418_p3 = por %p417_p2, %p416_p1 }
  0x1f   : > { %p419_p5 = pnand %p418_p3, %p412_p0 }
  0xef   : > { %v240_v3 = vpop.f32.mrb[0].mxu0 }
  0xf0   : > { %245 = vst.msk [vmem:[%s156_s5] sm:$0xff] %vm244_vm3, %v240_v3  ;;  %v351_v4 = vpop.f32.mrb[1].mxu0 }
  0xf1   : > { %422 = shalt.err (!%p419_p5)
}
  0xf2   : > { %s423_s24 = scalar_lea.hbm %s575_s15, 128  ;;  %s427_s27 = scalar_lea.hbm %s624_s2, 256 }
  0xf3   : > { %p424_p6 = scmp.ne.s32.totalorder %s575_s15, %s423_s24  ;;  %p428_p10 = scmp.lt.u32.totalorder %s575_s15, %s624_s2 }
  0xf4   : > { %p429_p11 = scmp.lt.u32.totalorder %s427_s27, %s423_s24  ;;  %p431_p13 = scmp.lt.u32.totalorder %s423_s24, %s575_s15 }
  0xf5   : > { %p425_p7 = pnand %p424_p6, %p547_p4 }
  0xf6   : > { %p430_p12 = por %p429_p11, %p428_p10 }
  0xf7   : > { %p426_p9 = pneg %p425_p7 }
  0xf8   : > { %p432_p0 = por %p431_p13, %p430_p12 }
  0xfa   : > { %p433_p1 = pnand %p432_p0, %p426_p9 }
  0xfc   : > { %436 = shalt.err (!%p433_p1)
}
  0xfd   : > { %352 = dma.vmem_to_hbm [thread:$0]  (%p547_p4), %s577_s6, 128, %s575_s15, %s247_s16  }
  0xfe PF: > { %p358_p2 = scmp.ge.s32.totalorder %s487_s14, 2  ;;  %s273_s30 = sand.u32 1, %s467_s9  }
  0xff   : > { %s274_s3 = scalar_lea.sflag [#allocation3], %s273_s30 }
 0x100   : > { %p355_p3 = pnand %p358_p2, %p554_p8 }
 0x102   : > { %462 = dma.done.wait (!%p355_p3), %s274_s3, 128  }
 0x103   : > { %464 = vsyncadd (!%p355_p3), %s274_s3, 4294967168  ;;  %s15_s14 = sadd.s32 1, %s487_s14   ;;  %s627_s9 = smov %s471_s10 }
 0x104   : > { %p12_p5 = scmp.ge.s32.totalorder %s15_s14, 4   ;;  %s628_s10 = smov %s475_s11 }
 0x105   : > { %s629_s11 = smov %s560_s22  ;;  %s630_s12 = smov %s483_s13 }
 0x106   : > { %s631_s13 = smov %s633_s17  ;;  %14 = sbr.rel (!%p12_p5) target bundleno = 4 (0x4), region = 63 }
 0x10d   :  { %279 = vsyncpa [#allocation3], 1 }
 0x10e   :  { %281 = vsyncpa [#allocation3 + $0x1], 1 }

</bundles_post_ra>
